<compile_context>
chip_gen: v7x
topology: tpu7x:2x2x1
jax: 0.10.0
libtpu: 0.0.40
codegen_flags: <defaults>
</compile_context>

<pallas_src>
import functools
import math

import jax
import jax.numpy as jnp
import numpy as np
from jax import lax
from jax.experimental import pallas as pl
from jax.experimental.pallas import tpu as pltpu


def _pick_batch_block(batch, seq_len, filters, *, max_block=8, vmem_budget=24 << 20):
    """Largest divisor of `batch` that (a) keeps the double-buffered in/out
    blocks plus the f32 temporaries under `vmem_budget` and (b) leaves >= 2
    grid steps when batch >= 2 (megacore / v7x's two TensorCores)."""
    lanes = ((seq_len + 127) // 128) * 128
    out_rows = ((seq_len + 1 + 7) // 8) * 8
    # Per batch element: 2x (shift block + out block) [double buffering] plus
    # ~4 f32 (F, L) channel-major temporaries (x1, x2, x1^T, scaled x2).
    per_elem = 4 * lanes * (2 * (out_rows + 8) + 4 * filters)
    bt = max(1, min(max_block, vmem_budget // per_elem, batch))
    if batch >= 2:
        bt = max(1, min(bt, batch // 2))   # keep >= 2 parallel grid steps
    while batch % bt:
        bt -= 1
    return bt


def _angle_kernel(shifts_ref, w1_ref, b1_ref, w2_ref, b2_ref, o_ref, *,
                  seq_len, filters, kernel_size, dot_precision):
    """One batch block per grid step.

    shifts_ref : (bt, K, L)   shifts[b, k, i] = x[b, i + k - K//2] (0 outside)
    w*_ref     : (F, K)       Conv1d weights (out_channels, taps)
    b*_ref     : (F, 1)       Conv1d bias (column vector)
    o_ref      : (bt, L+1, L) rows 0..L-1 = angle, row L = x
    """
    L, F, K = seq_len, filters, kernel_size

    # Conv1d(in=1, out=F, kernel=K, padding=K//2), both convs, as K shifted
    # broadcast-FMAs on the VPU in channel-major (bt, F, L) layout (L stays on
    # the lane axis; a K=3 MXU contraction would be <3% MXU utilization).
    x1 = b1_ref[...][None]                                    # (1, F, 1)
    x2 = b2_ref[...][None]
    for k in range(K):                                        # static unroll
        xk = shifts_ref[:, k:k + 1, :]                        # (bt, 1, L)
        x1 = x1 + xk * w1_ref[:, k:k + 1][None]               # -> (bt, F, L)
        x2 = x2 + xk * w2_ref[:, k:k + 1][None]               # -> (bt, F, L)

    # Column norms over the filter (sublane) axis; fold 1/(|x1_j| |x2_j|) into
    # the x2 operand (it depends only on the column index j, matching the torch
    # keepdim broadcast), so the MXU result streams straight to the store.
    n1sq = jnp.sum(x1 * x1, axis=1, keepdims=True)            # (bt, 1, L)
    n2sq = jnp.sum(x2 * x2, axis=1, keepdims=True)            # (bt, 1, L)
    x2 = x2 * lax.rsqrt(n1sq * n2sq)                          # single EUP rsqrt

    # angle[b, i, j] = sum_f x1[b, f, i] * x2_scaled[b, f, j]
    x1t = jnp.swapaxes(x1, 1, 2)                              # (bt, L, F) XLU
    angle = jnp.einsum("bif,bfj->bij", x1t, x2,               # (bt, L, L) MXU
                       precision=dot_precision,
                       preferred_element_type=jnp.float32)

    # Write the whole (bt, L+1, L) block once: angle rows + x (the center tap).
    o_ref[:, :L, :] = angle.astype(o_ref.dtype)
    o_ref[:, L:, :] = shifts_ref[:, K // 2:K // 2 + 1, :].astype(o_ref.dtype)


def angle_comparison(x, w1, b1, w2, b2, *, batch_block=None,
                     dot_precision=lax.Precision.DEFAULT,
                     out_dtype=jnp.float32):
    """x: (B, L); w*: (F, K); b*: (F,).  Returns (B, L+1, L)."""
    B, L = x.shape
    F, K = w1.shape
    pad = K // 2
    x = x.astype(jnp.float32)

    # K shifted zero-padded copies of x, laid out (B, K, L): L stays lane-dense.
    xp = jnp.pad(x, ((0, 0), (pad, pad)))
    shifts = jnp.stack([xp[:, k:k + L] for k in range(K)], axis=1)    # (B, K, L)

    w1f = w1.astype(jnp.float32)                                       # (F, K)
    w2f = w2.astype(jnp.float32)
    b1c = jnp.reshape(b1, (F, 1)).astype(jnp.float32)                  # (F, 1)
    b2c = jnp.reshape(b2, (F, 1)).astype(jnp.float32)

    bt = batch_block if batch_block is not None else _pick_batch_block(B, L, F)
    assert B % bt == 0, (B, bt)
    grid = (B // bt,)

    kernel = functools.partial(_angle_kernel, seq_len=L, filters=F,
                               kernel_size=K, dot_precision=dot_precision)

    return pl.pallas_call(
        kernel,
        out_shape=jax.ShapeDtypeStruct((B, L + 1, L), out_dtype),
        grid=grid,
        in_specs=[
            pl.BlockSpec((bt, K, L), lambda i: (i, 0, 0)),
            pl.BlockSpec((F, K), lambda i: (0, 0)),
            pl.BlockSpec((F, 1), lambda i: (0, 0)),
            pl.BlockSpec((F, K), lambda i: (0, 0)),
            pl.BlockSpec((F, 1), lambda i: (0, 0)),
        ],
        out_specs=pl.BlockSpec((bt, L + 1, L), lambda i: (i, 0, 0)),
        compiler_params=pltpu.CompilerParams(
            dimension_semantics=("parallel",),
        ),
    )(shifts, w1f, b1c, w2f, b2c)


def reference(x, w1, b1, w2, b2):
    """Pure-JAX reference mirroring the PyTorch forward (HIGHEST precision)."""
    B, L = x.shape
    F, K = w1.shape
    pad = K // 2
    prec = lax.Precision.HIGHEST
    xp = jnp.pad(x, ((0, 0), (pad, pad)))
    cols = jnp.stack([xp[:, k:k + L] for k in range(K)], axis=1)       # (B, K, L)
    x1 = jnp.einsum("fk,bkl->bfl", w1, cols, precision=prec) + b1[None, :, None]
    x2 = jnp.einsum("fk,bkl->bfl", w2, cols, precision=prec) + b2[None, :, None]
    dot = jnp.einsum("bfi,bfj->bij", x1, x2, precision=prec)
    n1 = jnp.sqrt(jnp.sum(x1 * x1, axis=1, keepdims=True))
    n2 = jnp.sqrt(jnp.sum(x2 * x2, axis=1, keepdims=True))
    angle = dot / (n1 * n2)
    return jnp.concatenate([angle, x[:, None, :]], axis=1)


if __name__ == "__main__":
    B, L = 4, 16          # batch, sequence length
    F, K = 32, 3          # filters, kernel_size (module defaults)

    key = jax.random.PRNGKey(0)
    k_x, k_w1, k_b1, k_w2, k_b2 = jax.random.split(key, 5)

    # Deterministic Conv1d-style init: U(-1/sqrt(in_ch*K), 1/sqrt(in_ch*K))
    bound = 1.0 / math.sqrt(1 * K)
    x = jax.random.normal(k_x, (B, L), dtype=jnp.float32)
    w1 = jax.random.uniform(k_w1, (F, K), jnp.float32, -bound, bound)
    b1 = jax.random.uniform(k_b1, (F,), jnp.float32, -bound, bound)
    w2 = jax.random.uniform(k_w2, (F, K), jnp.float32, -bound, bound)
    b2 = jax.random.uniform(k_b2, (F,), jnp.float32, -bound, bound)

    out = jax.block_until_ready(angle_comparison(x, w1, b1, w2, b2))
    ref = jax.block_until_ready(reference(x, w1, b1, w2, b2))

    assert out.shape == (B, L + 1, L), out.shape
    # Kernel's angle dot runs at DEFAULT precision (single bf16 MXU pass, f32
    # accumulation); tolerance sized for bf16 operand rounding vs. the f32
    # HIGHEST-precision reference.
    np.testing.assert_allclose(np.asarray(out), np.asarray(ref), rtol=2e-2, atol=2e-2)
    print("KERNEL_OK")
</pallas_src>

<mosaic_0001>
module attributes {stable_mosaic.version = 11 : i64} {
  func.func @_angle_kernel(%arg0: i32, %arg1: memref<2x3x16xf32, #tpu.memory_space<vmem>>, %arg2: memref<32x3xf32, #tpu.memory_space<vmem>>, %arg3: memref<32x1xf32, #tpu.memory_space<vmem>>, %arg4: memref<32x3xf32, #tpu.memory_space<vmem>>, %arg5: memref<32x1xf32, #tpu.memory_space<vmem>>, %arg6: memref<2x17x16xf32, #tpu.memory_space<vmem>>) attributes {dimension_semantics = [#tpu.dimension_semantics<parallel>], iteration_bounds = array<i64: 2>, scalar_prefetch = 0 : i64, scratch_operands = 0 : i64, tpu.core_type = #tpu.core_type<tc>, window_params = [{transform_indices = @transform_0, window_bounds = array<i64: 2, 3, 16>}, {pipeline_mode = #tpu.pipeline_mode<synchronous>, transform_indices = @transform_1, window_bounds = array<i64: 32, 3>}, {pipeline_mode = #tpu.pipeline_mode<synchronous>, transform_indices = @transform_2, window_bounds = array<i64: 32, 1>}, {pipeline_mode = #tpu.pipeline_mode<synchronous>, transform_indices = @transform_3, window_bounds = array<i64: 32, 3>}, {pipeline_mode = #tpu.pipeline_mode<synchronous>, transform_indices = @transform_4, window_bounds = array<i64: 32, 1>}, {transform_indices = @transform_5, window_bounds = array<i64: 2, 17, 16>}]} {
    %c0 = arith.constant 0 : index
    %c0_0 = arith.constant 0 : index
    %0 = vector.load %arg3[%c0, %c0_0] : memref<32x1xf32, #tpu.memory_space<vmem>>, vector<32x1xf32>
    %1 = vector.shape_cast %0 : vector<32x1xf32> to vector<1x32x1xf32>
    %c0_1 = arith.constant 0 : index
    %c0_2 = arith.constant 0 : index
    %2 = vector.load %arg5[%c0_1, %c0_2] : memref<32x1xf32, #tpu.memory_space<vmem>>, vector<32x1xf32>
    %3 = vector.shape_cast %2 : vector<32x1xf32> to vector<1x32x1xf32>
    %c0_3 = arith.constant 0 : index
    %c0_4 = arith.constant 0 : index
    %c0_5 = arith.constant 0 : index
    %4 = vector.load %arg1[%c0_3, %c0_4, %c0_5] : memref<2x3x16xf32, #tpu.memory_space<vmem>>, vector<2x1x16xf32>
    %c0_6 = arith.constant 0 : index
    %c0_7 = arith.constant 0 : index
    %5 = vector.load %arg2[%c0_6, %c0_7] : memref<32x3xf32, #tpu.memory_space<vmem>>, vector<32x1xf32>
    %6 = vector.shape_cast %5 : vector<32x1xf32> to vector<1x32x1xf32>
    %7 = vector.broadcast %4 : vector<2x1x16xf32> to vector<2x32x16xf32>
    %8 = vector.broadcast %6 : vector<1x32x1xf32> to vector<2x32x16xf32>
    %9 = arith.mulf %7, %8 : vector<2x32x16xf32>
    %10 = vector.broadcast %1 : vector<1x32x1xf32> to vector<2x32x16xf32>
    %11 = arith.addf %10, %9 : vector<2x32x16xf32>
    %c0_8 = arith.constant 0 : index
    %c0_9 = arith.constant 0 : index
    %12 = vector.load %arg4[%c0_8, %c0_9] : memref<32x3xf32, #tpu.memory_space<vmem>>, vector<32x1xf32>
    %13 = vector.shape_cast %12 : vector<32x1xf32> to vector<1x32x1xf32>
    %14 = vector.broadcast %4 : vector<2x1x16xf32> to vector<2x32x16xf32>
    %15 = vector.broadcast %13 : vector<1x32x1xf32> to vector<2x32x16xf32>
    %16 = arith.mulf %14, %15 : vector<2x32x16xf32>
    %17 = vector.broadcast %3 : vector<1x32x1xf32> to vector<2x32x16xf32>
    %18 = arith.addf %17, %16 : vector<2x32x16xf32>
    %c0_10 = arith.constant 0 : index
    %c1 = arith.constant 1 : index
    %c0_11 = arith.constant 0 : index
    %19 = vector.load %arg1[%c0_10, %c1, %c0_11] : memref<2x3x16xf32, #tpu.memory_space<vmem>>, vector<2x1x16xf32>
    %c0_12 = arith.constant 0 : index
    %c1_13 = arith.constant 1 : index
    %20 = vector.load %arg2[%c0_12, %c1_13] : memref<32x3xf32, #tpu.memory_space<vmem>>, vector<32x1xf32>
    %21 = vector.shape_cast %20 : vector<32x1xf32> to vector<1x32x1xf32>
    %22 = vector.broadcast %19 : vector<2x1x16xf32> to vector<2x32x16xf32>
    %23 = vector.broadcast %21 : vector<1x32x1xf32> to vector<2x32x16xf32>
    %24 = arith.mulf %22, %23 : vector<2x32x16xf32>
    %25 = arith.addf %11, %24 : vector<2x32x16xf32>
    %c0_14 = arith.constant 0 : index
    %c1_15 = arith.constant 1 : index
    %26 = vector.load %arg4[%c0_14, %c1_15] : memref<32x3xf32, #tpu.memory_space<vmem>>, vector<32x1xf32>
    %27 = vector.shape_cast %26 : vector<32x1xf32> to vector<1x32x1xf32>
    %28 = vector.broadcast %19 : vector<2x1x16xf32> to vector<2x32x16xf32>
    %29 = vector.broadcast %27 : vector<1x32x1xf32> to vector<2x32x16xf32>
    %30 = arith.mulf %28, %29 : vector<2x32x16xf32>
    %31 = arith.addf %18, %30 : vector<2x32x16xf32>
    %c0_16 = arith.constant 0 : index
    %c2 = arith.constant 2 : index
    %c0_17 = arith.constant 0 : index
    %32 = vector.load %arg1[%c0_16, %c2, %c0_17] : memref<2x3x16xf32, #tpu.memory_space<vmem>>, vector<2x1x16xf32>
    %c0_18 = arith.constant 0 : index
    %c2_19 = arith.constant 2 : index
    %33 = vector.load %arg2[%c0_18, %c2_19] : memref<32x3xf32, #tpu.memory_space<vmem>>, vector<32x1xf32>
    %34 = vector.shape_cast %33 : vector<32x1xf32> to vector<1x32x1xf32>
    %35 = vector.broadcast %32 : vector<2x1x16xf32> to vector<2x32x16xf32>
    %36 = vector.broadcast %34 : vector<1x32x1xf32> to vector<2x32x16xf32>
    %37 = arith.mulf %35, %36 : vector<2x32x16xf32>
    %38 = arith.addf %25, %37 : vector<2x32x16xf32>
    %c0_20 = arith.constant 0 : index
    %c2_21 = arith.constant 2 : index
    %39 = vector.load %arg4[%c0_20, %c2_21] : memref<32x3xf32, #tpu.memory_space<vmem>>, vector<32x1xf32>
    %40 = vector.shape_cast %39 : vector<32x1xf32> to vector<1x32x1xf32>
    %41 = vector.broadcast %32 : vector<2x1x16xf32> to vector<2x32x16xf32>
    %42 = vector.broadcast %40 : vector<1x32x1xf32> to vector<2x32x16xf32>
    %43 = arith.mulf %41, %42 : vector<2x32x16xf32>
    %44 = arith.addf %31, %43 : vector<2x32x16xf32>
    %45 = arith.mulf %38, %38 : vector<2x32x16xf32>
    %cst = arith.constant dense<0.000000e+00> : vector<2x16xf32>
    %46 = vector.multi_reduction <add>, %45, %cst [1] : vector<2x32x16xf32> to vector<2x16xf32>
    %47 = vector.shape_cast %46 : vector<2x16xf32> to vector<2x1x16xf32>
    %48 = arith.mulf %44, %44 : vector<2x32x16xf32>
    %cst_22 = arith.constant dense<0.000000e+00> : vector<2x16xf32>
    %49 = vector.multi_reduction <add>, %48, %cst_22 [1] : vector<2x32x16xf32> to vector<2x16xf32>
    %50 = vector.shape_cast %49 : vector<2x16xf32> to vector<2x1x16xf32>
    %51 = arith.mulf %47, %50 : vector<2x1x16xf32>
    %52 = math.rsqrt %51 : vector<2x1x16xf32>
    %53 = vector.broadcast %52 : vector<2x1x16xf32> to vector<2x32x16xf32>
    %54 = arith.mulf %44, %53 : vector<2x32x16xf32>
    %55 = tpu.transpose %38, [0, 2, 1] : vector<2x32x16xf32> -> vector<2x16x32xf32>
    "tpu.trace_start"() <{level = 10 : i32, message = "bif,bfj->bij"}> : () -> ()
    %cst_23 = arith.constant dense<0.000000e+00> : vector<2x16x16xf32>
    %56 = tpu.matmul %55, %54, %cst_23 {dimension_numbers = #tpu.dot_dimension_numbers<[2], [1], [1], [2], [0, 0, 0, 1, 1, 2], [0], [0]>} : vector<2x16x32xf32>, vector<2x32x16xf32>, vector<2x16x16xf32> -> vector<2x16x16xf32>
    "tpu.trace_stop"() : () -> ()
    %c0_24 = arith.constant 0 : index
    %c0_25 = arith.constant 0 : index
    %c0_26 = arith.constant 0 : index
    %57 = vector.load %arg6[%c0_24, %c0_25, %c0_26] : memref<2x17x16xf32, #tpu.memory_space<vmem>>, vector<2x16x16xf32>
    tpu.vector_store %arg6[%c0_24, %c0_25, %c0_26], %56 {strides = array<i32>} : memref<2x17x16xf32, #tpu.memory_space<vmem>>, vector<2x16x16xf32>,
    %c0_27 = arith.constant 0 : index
    %c1_28 = arith.constant 1 : index
    %c0_29 = arith.constant 0 : index
    %58 = vector.load %arg1[%c0_27, %c1_28, %c0_29] : memref<2x3x16xf32, #tpu.memory_space<vmem>>, vector<2x1x16xf32>
    %c0_30 = arith.constant 0 : index
    %c16 = arith.constant 16 : index
    %c0_31 = arith.constant 0 : index
    %59 = vector.load %arg6[%c0_30, %c16, %c0_31] : memref<2x17x16xf32, #tpu.memory_space<vmem>>, vector<2x1x16xf32>
    tpu.vector_store %arg6[%c0_30, %c16, %c0_31], %58 {strides = array<i32>} : memref<2x17x16xf32, #tpu.memory_space<vmem>>, vector<2x1x16xf32>,
    return
  }
  func.func @transform_0(%arg0: i32) -> (i32, i32, i32) {
    %c0_i32 = arith.constant 0 : i32
    %c0_i32_0 = arith.constant 0 : i32
    %c0_i32_1 = arith.constant 0 : i32
    return %arg0, %c0_i32, %c0_i32_0 : i32, i32, i32
  }
  func.func @transform_1(%arg0: i32) -> (i32, i32) {
    %c0_i32 = arith.constant 0 : i32
    %c0_i32_0 = arith.constant 0 : i32
    %c0_i32_1 = arith.constant 0 : i32
    return %c0_i32, %c0_i32_0 : i32, i32
  }
  func.func @transform_2(%arg0: i32) -> (i32, i32) {
    %c0_i32 = arith.constant 0 : i32
    %c0_i32_0 = arith.constant 0 : i32
    %c0_i32_1 = arith.constant 0 : i32
    return %c0_i32, %c0_i32_0 : i32, i32
  }
  func.func @transform_3(%arg0: i32) -> (i32, i32) {
    %c0_i32 = arith.constant 0 : i32
    %c0_i32_0 = arith.constant 0 : i32
    %c0_i32_1 = arith.constant 0 : i32
    return %c0_i32, %c0_i32_0 : i32, i32
  }
  func.func @transform_4(%arg0: i32) -> (i32, i32) {
    %c0_i32 = arith.constant 0 : i32
    %c0_i32_0 = arith.constant 0 : i32
    %c0_i32_1 = arith.constant 0 : i32
    return %c0_i32, %c0_i32_0 : i32, i32
  }
  func.func @transform_5(%arg0: i32) -> (i32, i32, i32) {
    %c0_i32 = arith.constant 0 : i32
    %c0_i32_0 = arith.constant 0 : i32
    %c0_i32_1 = arith.constant 0 : i32
    return %arg0, %c0_i32, %c0_i32_0 : i32, i32, i32
  }
}

</mosaic_0001>

<bundles_post_ra>
// kernel: tpu_custom_call.1
= control target key start
LH: loop header
LB: loop body
LE: loop exit
PB: predicated region body
PF: predicated region fallthrough
CT: control target
= control target key end

     0   :  { %s1031_s18 = smov 0   ;;  %s1294_s0 = inlined_call_operand.vmem [shape: f32[4,3,16], index: 0, kind: input, shape index: {}]   ;;  %s1295_s1 = inlined_call_operand.vmem [shape: f32[32,3], index: 1, kind: input, shape index: {}]   ;;  %s1296_s2 = inlined_call_operand.vmem [shape: f32[32,1], index: 2, kind: input, shape index: {}]   ;;  %s1297_s3 = inlined_call_operand.vmem [shape: f32[32,3], index: 3, kind: input, shape index: {}]   ;;  %s1298_s4 = inlined_call_operand.vmem [shape: f32[32,1], index: 4, kind: input, shape index: {}]   ;;  %s1299_s5 = inlined_call_operand.vmem [shape: f32[4,17,16], index: 5, kind: output, shape index: {}]  }
   0x1 LB: > { %s891_s19 = sadd.s32 4294967295, %s996_s18   ;;  %p895_p0 = scmp.ge.s32.totalorder %s996_s18, 1  ;;  %s996_s18 = sphi %s1031_s18, %s15_s18  }
   0x2   : > { %p188_p1 = scmp.lt.s32.totalorder %s996_s18, 3 }
   0x4   : > { %p189_p2 = pnand %p895_p0, %p188_p1 }
   0x5   : > { %v308_v0 = vld [vmem:[%s1297_s3] sm:$0xff] (!%p189_p2)  ;;  %v998_v2 = vmov (!%p189_p2), 0   ;;  %v309_v3 = vld [vmem:[%s1297_s3 + $0x8] sm:$0xff] (!%p189_p2)  ;;  %v242_v5 = vld [vmem:[%s1295_s1 + $0x10] sm:$0xff] (!%p189_p2)  ;;  %v999_v12 = vmov (!%p189_p2), 1   ;;  %v1000_v17 = vmov (!%p189_p2), 2  }
   0x6   : > { %192 = sbr.rel (%p189_p2) target bundleno = 550 (0x226), region = 40  ;;  %v240_v1 = vld [vmem:[%s1295_s1] sm:$0xff] (!%p189_p2)  ;;  %976 = vset.pattern.permute.xlu1 (!%p189_p2), %v998_v2  ;;  %975 = vset.pattern.permute.xlu0 (!%p189_p2), %v998_v2  ;;  %v241_v4 = vld [vmem:[%s1295_s1 + $0x8] sm:$0xff] (!%p189_p2)  ;;  %v310_v8 = vld [vmem:[%s1297_s3 + $0x10] sm:$0xff] (!%p189_p2)  ;;  %s896_s29 = sshll.u32 (!%p189_p2), %s891_s19, 1  ;;  %vm524_vm0 = vcmask (!%p189_p2), 130048  }
   0x7   : > { %314 = vperm.xlu1 (!%p189_p2), %976, %v308_v0   ;;  %254 = vperm.xlu0 (!%p189_p2), %975, %v240_v1   ;;  %v230_v6 = vld [vmem:[%s1296_s2] sm:$0xff] (!%p189_p2)  ;;  %v231_v7 = vld [vmem:[%s1296_s2 + $0x8] sm:$0xff] (!%p189_p2)  ;;  %v232_v11 = vld [vmem:[%s1296_s2 + $0x10] sm:$0xff] (!%p189_p2)  ;;  %p218_p3 = scmp.lt.s32.totalorder (!%p189_p2), %s896_s29, 3  ;;  %vm661_vm1 = vcmask (!%p189_p2), 261120   ;;  %vm830_vm2 = vcmask (!%p189_p2), 122880  }
   0x8   : > { %v234_v9 = vld [vmem:[%s1298_s4] sm:$0xff] (!%p189_p2)  ;;  %v235_v10 = vld [vmem:[%s1298_s4 + $0x8] sm:$0xff] (!%p189_p2)  ;;  %v233_v13 = vld [vmem:[%s1296_s2 + $0x18] sm:$0xff] (!%p189_p2) }
   0x9   : > { %v243_v14 = vld [vmem:[%s1295_s1 + $0x18] sm:$0xff] (!%p189_p2)  ;;  %v236_v16 = vld [vmem:[%s1298_s4 + $0x10] sm:$0xff] (!%p189_p2) }
   0xa   : > { %v311_v15 = vld [vmem:[%s1297_s3 + $0x18] sm:$0xff] (!%p189_p2) }
   0xb   : > { %319 = vperm.xlu1 (!%p189_p2), %976, %v309_v3   ;;  %259 = vperm.xlu0 (!%p189_p2), %975, %v241_v4   ;;  %v237_v18 = vld [vmem:[%s1298_s4 + $0x18] sm:$0xff] (!%p189_p2) }
   0xd   : > { %s1301_s29 = smov (!%p218_p3, %s896_s29), 3 }
   0xe   : > { %s897_s30 = sshll.u32 %s1301_s29, 2  ;;  %s962_s8 = smul.u32 24, %s1301_s29 }
   0xf   : > { %264 = vperm.xlu0 %975, %v242_v5   ;;  %282 = vperm.xlu1 %976, %v230_v6   ;;  %s1123_s7 = scalar_lea.vmem %s1294_s0, %s897_s30 }
  0x10   : > { %v1126_v39 = vld [vmem:[%s1123_s7] ss:$0 sm:$0xff]  ;;  %v1129_v40 = vld [vmem:[%s1123_s7 + $0x4] ss:$0 sm:$0xff]  ;;  %v1140_v47 = vld [vmem:[%s1123_s7 + $0x1] ss:$0 sm:$0xff]  ;;  %s228_s11 = scalar_lea.vmem %s1299_s5, %s962_s8 }
  0x11   : > { %v1143_v48 = vld [vmem:[%s1123_s7 + $0x5] ss:$0 sm:$0xff]  ;;  %v1150_v58 = vld [vmem:[%s1123_s7 + $0x2] ss:$0 sm:$0xff]  ;;  %v1153_v59 = vld [vmem:[%s1123_s7 + $0x6] ss:$0 sm:$0xff] }
  0x13   : > { %287 = vperm.xlu0 %975, %v231_v7   ;;  %324 = vperm.xlu1 %976, %v310_v8  }
  0x17   : > { %342 = vperm.xlu0 %975, %v234_v9   ;;  %347 = vperm.xlu1 %976, %v235_v10  }
  0x1b   : > { %292 = vperm.xlu0 %975, %v232_v11   ;;  %977 = vset.pattern.permute.xlu1 %v999_v12 }
  0x1c   : > { %383 = vperm.xlu1 %977, %v241_v4  }
  0x1f   : > { %297 = vperm.xlu0 %975, %v233_v13  }
  0x20   : > { %411 = vperm.xlu1 %977, %v308_v0  }
  0x23   : > { %981 = vset.pattern.permute.xlu0 %v999_v12 }
  0x24   : > { %379 = vperm.xlu0 %981, %v240_v1   ;;  %978 = vset.pattern.permute.xlu1 %v998_v2 }
  0x25   : > { %269 = vperm.xlu1 %978, %v243_v14  }
  0x28   : > { %415 = vperm.xlu0 %981, %v309_v3  }
  0x29   : > { %329 = vperm.xlu1 %978, %v311_v15  }
  0x2c   : > { %387 = vperm.xlu0 %981, %v242_v5  }
  0x2d   : > { %352 = vperm.xlu1 %978, %v236_v16  }
  0x30   : > { %423 = vperm.xlu0 %981, %v311_v15  }
  0x31   : > { %979 = vset.pattern.permute.xlu1 %v999_v12 }
  0x32   : > { %419 = vperm.xlu1 %979, %v310_v8  }
  0x34   : > { %984 = vset.pattern.permute.xlu0 %v1000_v17 }
  0x35   : > { %457 = vperm.xlu0 %984, %v241_v4  }
  0x36   : > { %980 = vset.pattern.permute.xlu1 %v1000_v17 }
  0x37   : > { %453 = vperm.xlu1 %980, %v240_v1  }
  0x39   : > { %465 = vperm.xlu0 %984, %v243_v14  }
  0x3b   : > { %485 = vperm.xlu1 %980, %v308_v0  }
  0x3f   : > { %489 = vperm.xlu1 %980, %v309_v3  }
  0x43   : > { %982 = vset.pattern.permute.xlu1 %v998_v2 }
  0x44   : > { %357 = vperm.xlu1 %982, %v237_v18  }
  0x48   : > { %983 = vset.pattern.permute.xlu1 %v999_v12 }
  0x49   : > { %391 = vperm.xlu1 %983, %v243_v14  }
  0x4d   : > { %985 = vset.pattern.permute.xlu1 %v1000_v17 }
  0x4e   : > { %461 = vperm.xlu1 %985, %v242_v5  }
  0x52   : > { %493 = vperm.xlu1 %985, %v310_v8  }
  0x56   : > { %497 = vperm.xlu1 %985, %v311_v15  }
  0x86   : > { %v1087_v19 = vpop.permute.xlu1 %314  ;;  %v255_v20 = vpop.permute.xlu0 %254 }
  0x87   : > { %v272_v42 = vmul.f32 %v1126_v39, %v255_v20  ;;  %v276_v43 = vmul.f32 %v1129_v40, %v255_v20  ;;  %v336_v1 = vmul.f32 %v1129_v40, %v1087_v19 }
  0x8a   : > { %v1089_v21 = vpop.permute.xlu1 %319  ;;  %v260_v22 = vpop.permute.xlu0 %259 }
  0x8b   : > { %v273_v45 = vmul.f32 %v1126_v39, %v260_v22  ;;  %v277_v46 = vmul.f32 %v1129_v40, %v260_v22  ;;  %v337_v7 = vmul.f32 %v1129_v40, %v1089_v21 }
  0x8e   : > { %v1091_v23 = vpop.permute.xlu0 %264  ;;  %v283_v24 = vpop.permute.xlu1 %282 }
  0x8f   : > { %v300_v51 = vadd.f32 %v283_v24, %v272_v42  ;;  %v304_v52 = vadd.f32 %v283_v24, %v276_v43 }
  0x92   : > { %v288_v25 = vpop.permute.xlu0 %287  ;;  %v1093_v26 = vpop.permute.xlu1 %324 }
  0x93   : > { %v301_v53 = vadd.f32 %v288_v25, %v273_v45  ;;  %v305_v54 = vadd.f32 %v288_v25, %v277_v46  ;;  %v332_v25 = vmul.f32 %v1126_v39, %v1087_v19  ;;  %v333_v19 = vmul.f32 %v1126_v39, %v1089_v21 }
  0x96   : > { %v1095_v27 = vpop.permute.xlu0 %342  ;;  %v1097_v28 = vpop.permute.xlu1 %347 }
  0x97   : > { %v364_v8 = vadd.f32 %v1095_v27, %v336_v1  ;;  %v365_v15 = vadd.f32 %v1097_v28, %v337_v7  ;;  %v361_v21 = vadd.f32 %v1097_v28, %v333_v19 }
  0x9a   : > { %v1099_v29 = vpop.permute.xlu0 %292 }
  0x9b   : > { %v384_v30 = vpop.permute.xlu1 %383 }
  0x9c   : > { %v395_v55 = vmul.f32 %v1140_v47, %v384_v30  ;;  %v399_v56 = vmul.f32 %v1143_v48, %v384_v30  ;;  %v274_v30 = vmul.f32 %v1126_v39, %v1091_v23 }
  0x9e   : > { %v1101_v31 = vpop.permute.xlu0 %297  ;;  %v403_v10 = vadd.f32 %v395_v55, %v301_v53  ;;  %v407_v11 = vadd.f32 %v399_v56, %v305_v54  ;;  %v338_v53 = vmul.f32 %v1129_v40, %v1093_v26 }
  0x9f   : > { %v1105_v32 = vpop.permute.xlu1 %411 }
  0xa0   : > { %v430_v2 = vmul.f32 %v1143_v48, %v1105_v32  ;;  %v426_v42 = vmul.f32 %v1140_v47, %v1105_v32  ;;  %v360_v32 = vadd.f32 %v1095_v27, %v332_v25 }
  0xa2   : > { %v438_v13 = vadd.f32 %v430_v2, %v364_v8  ;;  %v434_v55 = vadd.f32 %v426_v42, %v360_v32 }
  0xa3   : > { %v380_v33 = vpop.permute.xlu0 %379 }
  0xa4   : > { %v1107_v34 = vpop.permute.xlu1 %269  ;;  %v394_v49 = vmul.f32 %v1140_v47, %v380_v33  ;;  %v398_v50 = vmul.f32 %v1143_v48, %v380_v33  ;;  %v278_v33 = vmul.f32 %v1129_v40, %v1091_v23  ;;  %v334_v23 = vmul.f32 %v1126_v39, %v1093_v26 }
  0xa5   : > { %v275_v43 = vmul.f32 %v1126_v39, %v1107_v34 }
  0xa6   : > { %v402_v61 = vadd.f32 %v394_v49, %v300_v51  ;;  %v406_v62 = vadd.f32 %v398_v50, %v304_v52  ;;  %v279_v49 = vmul.f32 %v1129_v40, %v1107_v34  ;;  %v302_v34 = vadd.f32 %v1099_v29, %v274_v30 }
  0xa7   : > { %v1111_v35 = vpop.permute.xlu0 %415  ;;  %v306_v54 = vadd.f32 %v1099_v29, %v278_v33  ;;  %v303_v56 = vadd.f32 %v1101_v31, %v275_v43 }
  0xa8   : > { %v1113_v36 = vpop.permute.xlu1 %329  ;;  %v431_v12 = vmul.f32 %v1143_v48, %v1111_v35  ;;  %v427_v50 = vmul.f32 %v1140_v47, %v1111_v35 }
  0xa9   : > { %v335_v29 = vmul.f32 %v1126_v39, %v1113_v36 }
  0xaa   : > { %v439_v22 = vadd.f32 %v431_v12, %v365_v15 }
  0xab   : > { %v1116_v37 = vpop.permute.xlu0 %387 }
  0xac   : > { %v1118_v38 = vpop.permute.xlu1 %352  ;;  %v400_v26 = vmul.f32 %v1143_v48, %v1116_v37 }
  0xad   : > { %v366_v1 = vadd.f32 %v1118_v38, %v338_v53 }
  0xae   : > { %v408_v8 = vadd.f32 %v400_v26, %v306_v54 }
  0xaf   : > { %v1131_v41 = vpop.permute.xlu0 %423 }
  0xb0   : > { %v433_v15 = vmul.f32 %v1143_v48, %v1131_v41 }
  0xb1   : > { %v1135_v44 = vpop.permute.xlu1 %419 }
  0xb2   : > { %v428_v2 = vmul.f32 %v1140_v47, %v1135_v44 }
  0xb4   : > { %v458_v57 = vpop.permute.xlu0 %457 }
  0xb5   : > { %v469_v3 = vmul.f32 %v1150_v58, %v458_v57  ;;  %v473_v4 = vmul.f32 %v1153_v59, %v458_v57  ;;  %v307_v57 = vadd.f32 %v1101_v31, %v279_v49  ;;  %v362_v31 = vadd.f32 %v1118_v38, %v334_v23 }
  0xb6   : > { %v454_v60 = vpop.permute.xlu1 %453 }
  0xb7   : > { %v468_v63 = vmul.f32 %v1150_v58, %v454_v60  ;;  %v472_v0 = vmul.f32 %v1153_v59, %v454_v60  ;;  %v477_v16 = vadd.f32 %v469_v3, %v403_v10  ;;  %v481_v17 = vadd.f32 %v473_v4, %v407_v11 }
  0xb8   : > { %v396_v60 = vmul.f32 %v1140_v47, %v1116_v37  ;;  %v432_v37 = vmul.f32 %v1143_v48, %v1135_v44 }
  0xb9   : > { %v1163_v5 = vadd.f32 %v468_v63, %v402_v61  ;;  %v1165_v6 = vadd.f32 %v472_v0, %v406_v62  ;;  %v466_v61 = vpop.permute.xlu0 %465  ;;  %v435_v62 = vadd.f32 %v427_v50, %v361_v21  ;;  %v339_v63 = vmul.f32 %v1129_v40, %v1113_v36 }
  0xba   : > { %v486_v9 = vpop.permute.xlu1 %485  ;;  %v471_v7 = vmul.f32 %v1150_v58, %v466_v61  ;;  %v475_v36 = vmul.f32 %v1153_v59, %v466_v61  ;;  %v404_v40 = vadd.f32 %v396_v60, %v302_v34  ;;  %v440_v25 = vadd.f32 %v432_v37, %v366_v1 }
  0xbb   : > { %629 = vxpose.xlu0.b32.start [1/4] (short) (narrow) %v1165_v6, 16  ;;  %597 = vxpose.xlu1.b32.start [1/4] (short) (narrow) %v1163_v5, 16  ;;  %v504_v14 = vmul.f32 %v1153_v59, %v486_v9  ;;  %v516_v38 = vmul.f32 %v1163_v5, %v1163_v5  ;;  %v520_v10 = vmul.f32 %v1165_v6, %v1165_v6 }
  0xbc   : > { %v500_v11 = vmul.f32 %v1150_v58, %v486_v9 }
  0xbd   : > { %v1176_v18 = vadd.f32 %v504_v14, %v438_v13  ;;  %v429_v14 = vmul.f32 %v1140_v47, %v1131_v41  ;;  %v525_v6 = vsel %vm524_vm0, %v516_v38, 0.0  ;;  %v538_v9 = vsel %vm524_vm0, %v520_v10, 0.0 }
  0xbe   : > { %v490_v20 = vpop.permute.xlu1 %489 }
  0xbf   : > { %v505_v24 = vmul.f32 %v1153_v59, %v490_v20  ;;  %630 = vxpose.xlu0.b32.cont [2/4] (short) (narrow) %v481_v17, 16  ;;  %598 = vxpose.xlu1.b32.cont [2/4] (short) (narrow) %v477_v16, 16  ;;  %v555_v45 = vmul.f32 %v1176_v18, %v1176_v18  ;;  %v501_v0 = vmul.f32 %v1150_v58, %v490_v20 }
  0xc0   : > { %v517_v20 = vmul.f32 %v477_v16, %v477_v16 }
  0xc1   : > { %v1191_v46 = vadd.f32 %v505_v24, %v439_v22  ;;  %v572_v27 = vsel %vm524_vm0, %v555_v45, 0.0  ;;  %v1239_v44 = vadd.f32 %v501_v0, %v435_v62  ;;  %v521_v22 = vmul.f32 %v481_v17, %v481_v17 }
  0xc2   : > { %v436_v24 = vadd.f32 %v428_v2, %v362_v31  ;;  %v1249_v45 = vadd.f32 %v500_v11, %v434_v55  ;;  %v526_v16 = vsel %vm524_vm0, %v517_v20, 0.0 }
  0xc3   : > { %v556_v51 = vmul.f32 %v1191_v46, %v1191_v46  ;;  %v358_v52 = vpop.permute.xlu1 %357  ;;  %v552_v41 = vmul.f32 %v1239_v44, %v1239_v44  ;;  %v539_v17 = vsel %vm524_vm0, %v521_v22, 0.0  ;;  %v527_v23 = vadd.f32 %v526_v16, %v525_v6 }
  0xc4   : > { %v540_v32 = vadd.f32 %v539_v17, %v538_v9 }
  0xc5   : > { %v573_v35 = vsel %vm524_vm0, %v556_v51, 0.0 }
  0xc6   : > { %v1217_v28 = vadd.f32 %v573_v35, %v572_v27 }
  0xc8   : > { %v392_v3 = vpop.permute.xlu1 %391 }
  0xc9   : > { %v397_v4 = vmul.f32 %v1140_v47, %v392_v3  ;;  %v401_v39 = vmul.f32 %v1143_v48, %v392_v3  ;;  %v363_v47 = vadd.f32 %v358_v52, %v335_v29  ;;  %v367_v48 = vadd.f32 %v358_v52, %v339_v63 }
  0xca   : > { %v551_v52 = vmul.f32 %v1249_v45, %v1249_v45 }
  0xcb   : > { %v405_v12 = vadd.f32 %v397_v4, %v303_v56  ;;  %v409_v13 = vadd.f32 %v401_v39, %v307_v57  ;;  %v560_v56 = vsel %vm524_vm0, %v552_v41, 0.0  ;;  %v437_v27 = vadd.f32 %v429_v14, %v363_v47 }
  0xcc   : > { %v441_v35 = vadd.f32 %v433_v15, %v367_v48  ;;  %v559_v4 = vsel %vm524_vm0, %v551_v52, 0.0 }
  0xcd   : > { %v479_v5 = vadd.f32 %v471_v7, %v405_v12  ;;  %v483_v30 = vadd.f32 %v475_v36, %v409_v13  ;;  %v462_v33 = vpop.permute.xlu1 %461  ;;  %v561_v10 = vadd.f32 %v560_v56, %v559_v4 }
  0xce   : > { %v470_v42 = vmul.f32 %v1150_v58, %v462_v33  ;;  %v474_v43 = vmul.f32 %v1153_v59, %v462_v33 }
  0xcf   : > { %v519_v50 = vmul.f32 %v479_v5, %v479_v5  ;;  %v523_v51 = vmul.f32 %v483_v30, %v483_v30 }
  0xd0   : > { %v478_v19 = vadd.f32 %v470_v42, %v404_v40  ;;  %v482_v49 = vadd.f32 %v474_v43, %v408_v8 }
  0xd1   : > { %v494_v53 = vpop.permute.xlu1 %493  ;;  %v530_v62 = vsel %vm524_vm0, %v519_v50, 0.0  ;;  %v543_v29 = vsel %vm524_vm0, %v523_v51, 0.0 }
  0xd2   : > { %v518_v21 = vmul.f32 %v478_v19, %v478_v19  ;;  %v522_v34 = vmul.f32 %v482_v49, %v482_v49  ;;  %v502_v54 = vmul.f32 %v1150_v58, %v494_v53  ;;  %v506_v55 = vmul.f32 %v1153_v59, %v494_v53  ;;  %631 = vxpose.xlu0.b32.cont [3/4] (short) (narrow) %v482_v49, 16 }
  0xd3   : > { %599 = vxpose.xlu1.b32.cont [3/4] (short) (narrow) %v478_v19, 16 }
  0xd4   : > { %v528_v57 = vsel %vm524_vm0, %v518_v21, 0.0  ;;  %v541_v60 = vsel %vm524_vm0, %v522_v34, 0.0  ;;  %v510_v26 = vadd.f32 %v502_v54, %v436_v24  ;;  %v1262_v61 = vadd.f32 %v506_v55, %v440_v25 }
  0xd5   : > { %v529_v63 = vadd.f32 %v528_v57, %v527_v23  ;;  %v542_v0 = vadd.f32 %v541_v60, %v540_v32  ;;  %v498_v31 = vpop.permute.xlu1 %497 }
  0xd6   : > { %v553_v1 = vmul.f32 %v510_v26, %v510_v26  ;;  %v557_v2 = vmul.f32 %v1262_v61, %v1262_v61  ;;  %v503_v37 = vmul.f32 %v1150_v58, %v498_v31  ;;  %v507_v3 = vmul.f32 %v1153_v59, %v498_v31  ;;  %632 = vxpose.xlu0.b32.end [4/4] (short) (narrow) %v483_v30, 16 }
  0xd7   : > { %v531_v39 = vadd.f32 %v530_v62, %v529_v63  ;;  %v544_v7 = vadd.f32 %v543_v29, %v542_v0  ;;  %600 = vxpose.xlu1.b32.end [4/4] (short) (narrow) %v479_v5, 16 }
  0xd8   : > { %v562_v36 = vsel %vm524_vm0, %v553_v1, 0.0  ;;  %v575_v40 = vsel %vm524_vm0, %v557_v2, 0.0  ;;  %v511_v8 = vadd.f32 %v503_v37, %v437_v27  ;;  %v515_v38 = vadd.f32 %v507_v3, %v441_v35 }
  0xd9   : > { %v532_v11 = vrot.slane %v531_v39, 4  ;;  %v545_v12 = vrot.slane %v544_v7, 4  ;;  %v563_v59 = vadd.f32 %v562_v36, %v561_v10  ;;  %v576_v20 = vadd.f32 %v575_v40, %v1217_v28 }
  0xda   : > { %v554_v13 = vmul.f32 %v511_v8, %v511_v8  ;;  %v558_v14 = vmul.f32 %v515_v38, %v515_v38 }
  0xdb   : > { %v533_v58 = vadd.f32 %v532_v11, %v531_v39  ;;  %v546_v15 = vadd.f32 %v545_v12, %v544_v7 }
  0xdc   : > { %v564_v22 = vsel %vm524_vm0, %v554_v13, 0.0  ;;  %v577_v24 = vsel %vm524_vm0, %v558_v14, 0.0 }
  0xdd   : > { %v534_v25 = vrot.slane %v533_v58, 2  ;;  %v547_v5 = vrot.slane %v546_v15, 2  ;;  %v565_v30 = vadd.f32 %v564_v22, %v563_v59  ;;  %v578_v33 = vadd.f32 %v577_v24, %v576_v20 }
  0xdf   : > { %v566_v6 = vrot.slane %v565_v30, 4  ;;  %v579_v9 = vrot.slane %v578_v33, 4  ;;  %v535_v42 = vadd.f32 %v534_v25, %v533_v58  ;;  %v548_v43 = vadd.f32 %v547_v5, %v546_v15 }
  0xe1   : > { %v567_v41 = vadd.f32 %v566_v6, %v565_v30  ;;  %v580_v47 = vadd.f32 %v579_v9, %v578_v33  ;;  %v536_v17 = vrot.slane %v535_v42, 1  ;;  %v549_v19 = vrot.slane %v548_v43, 1 }
  0xe3   : > { %v568_v48 = vrot.slane %v567_v41, 2  ;;  %v581_v16 = vrot.slane %v580_v47, 2  ;;  %v537_v50 = vadd.f32 %v536_v17, %v535_v42  ;;  %v550_v51 = vadd.f32 %v549_v19, %v548_v43 }
  0xe5   : > { %v569_v49 = vadd.f32 %v568_v48, %v567_v41  ;;  %v582_v28 = vadd.f32 %v581_v16, %v580_v47 }
  0xe7   : > { %v570_v23 = vrot.slane %v569_v49, 1  ;;  %v583_v32 = vrot.slane %v582_v28, 1 }
  0xe9   : > { %v571_v53 = vadd.f32 %v570_v23, %v569_v49  ;;  %v584_v21 = vadd.f32 %v583_v32, %v582_v28 }
  0xeb   : > { %v585_v34 = vmul.f32 %v571_v53, %v537_v50  ;;  %v586_v54 = vmul.f32 %v584_v21, %v550_v51 }
  0xed   : > { %986 = vrsqrt.f32 %v585_v34 }
  0xee   : > { %988 = vrsqrt.f32 %v586_v54 }
  0xf7   : > { %v987_v55 = vpop.eup %986 }
  0xf8   : > { %v989_v52 = vpop.eup %988  ;;  %v592_v56 = vmul.f32 %v987_v55, %v511_v8  ;;  %v589_v27 = vmul.f32 %v987_v55, %v1249_v45  ;;  %v590_v35 = vmul.f32 %v987_v55, %v1239_v44  ;;  %v591_v57 = vmul.f32 %v987_v55, %v510_v26  ;;  %v828_v26 = vld [vmem:[%s1123_s7 + $0x1] sm:$0x1] }
  0xf9   : > { %v596_v60 = vmul.f32 %v989_v52, %v515_v38  ;;  %v593_v62 = vmul.f32 %v989_v52, %v1176_v18  ;;  %v594_v29 = vmul.f32 %v989_v52, %v1191_v46  ;;  %v595_v63 = vmul.f32 %v989_v52, %v1262_v61  ;;  %v829_v61 = vld [vmem:[%s1123_s7 + $0x5] sm:$0x1]  ;;  %831 = vst.msk [vmem:[%s228_s11 + $0x10] sm:$0x1] %vm830_vm2, %v828_v26 }
  0xfa   : > { %v946_v0 = vpack.c.bf16 %v590_v35, %v589_v27  ;;  %v950_v1 = vpack.c.bf16 %v592_v56, %v591_v57  ;;  %832 = vst.msk [vmem:[%s228_s11 + $0x28] sm:$0x1] %vm830_vm2, %v829_v61 }
  0xfb   : > { %v954_v31 = vpack.c.bf16 %v594_v29, %v593_v62  ;;  %v958_v2 = vpack.c.bf16 %v596_v60, %v595_v63 }
  0xfc   : > { %947 = vmatprep.subr.bf16.mxu0 %v946_v0 }
  0xfd   : > { %955 = vmatprep.subr.bf16.mxu1 %v954_v31  ;;  %949 = vmatpush3.bf16.msra.mxu0 %v946_v0 }
  0xfe   : > { %957 = vmatpush3.bf16.msra.mxu1 %v954_v31  ;;  %951 = vmatprep.subr.bf16.mxu0 %v950_v1 }
  0xff   : > { %959 = vmatprep.subr.bf16.mxu1 %v958_v2 }
 0x101   : > { %953 = vmatpush3.bf16.msra.mxu0 %v950_v1 }
 0x102   : > { %961 = vmatpush3.bf16.msra.mxu1 %v958_v2 }
 0x14a   : > { %v645_v18 = vpop.trf.xlu0 }
 0x14b   : > { %v613_v46 = vpop.trf.xlu1  ;;  %943 = vmatprep.mubr.msk.f32.mxu1 %vm661_vm1, %v645_v18 }
 0x14c   : > { %932 = vmatprep.mubr.msk.f32.mxu0 %vm661_vm1, %v613_v46 }
 0x14e   : > { %v646_v44 = vpop.trf.xlu0 }
 0x14f   : > { %v614_v45 = vpop.trf.xlu1  ;;  %944 = vmatmul.mubr.msk.f32.vlgmr.msra.gmra.mrb[0].mxu1 %vm661_vm1, %v646_v44 }
 0x150   : > { %933 = vmatmul.mubr.msk.f32.vlgmr.msra.gmra.mrb[0].mxu0 %vm661_vm1, %v614_v45 }
 0x222   : > { %v945_v37 = vpop.f32.mrb[0].mxu1 }
 0x223   : > { %v934_v3 = vpop.f32.mrb[0].mxu0  ;;  %v815_v4 = vpop.f32.mrb[1].mxu1  ;;  %827 = vst.msk [vmem:[%s228_s11 + $0x20] sm:$0xff] %vm524_vm0, %v945_v37 }
 0x224   : > { %825 = vst.msk [vmem:[%s228_s11 + $0x8] sm:$0xff] %vm524_vm0, %v934_v3  ;;  %v734_v39 = vpop.f32.mrb[1].mxu0  ;;  %826 = vst.msk [vmem:[%s228_s11 + $0x18] sm:$0xff] %vm524_vm0, %v815_v4 }
 0x225   : > { %824 = vst.msk [vmem:[%s228_s11] sm:$0xff] %vm524_vm0, %v734_v39 }
 0x226 PF: > { %s15_s18 = sadd.s32 1, %s996_s18  }
 0x227   : > { %p12_p4 = scmp.ge.s32.totalorder %s15_s18, 4  }
 0x229   :  { %14 = sbr.rel (!%p12_p4) target bundleno = 1 (0x1), region = 70 }

</bundles_post_ra>
